<compile_context>
chip_gen: v7x
topology: tpu7x:2x2x1
jax: 0.10.0
libtpu: 0.0.40
codegen_flags: <defaults>
</compile_context>

<pallas_src>
import functools

import jax
import jax.numpy as jnp
from jax.experimental import pallas as pl
from jax.experimental.pallas import tpu as pltpu

LANE = 128      # lane width == hidden width
SUB = 8         # f32 sublane granularity
ALIGN = 16      # row alignment inside the packed weight buffer (covers bf16 (16,128) tiling)
HIDDEN = 128
MAX_TILE = 2048  # per-step batch tile cap (v5e scoped-VMEM headroom)


def _round_up(n, m):
    return (n + m - 1) // m * m


def _mlp_kernel(x_ref, w_ref, b_ref, o_ref, *, state_dim, sd_pad, hidden):
    """One batch tile of the fused 3-layer MLP.

    x_ref : (TM, state_dim)            activations (input dtype)
    w_ref : (sd_pad + 2*hidden, 128)   packed weights, compute dtype, VMEM-resident
    b_ref : (8, 128) f32               rows 0/1/2 = b1/b2/b3 (padded cols are zero)
    o_ref : (TM, 128)                  lane-dense logits slab (cols >= action_dim are junk)
    """
    cd = w_ref.dtype
    x = x_ref[...].astype(cd)

    # Static, aligned views into the packed weight buffer (no per-step casts).
    w1 = w_ref[0:state_dim, :]
    w2 = w_ref[sd_pad:sd_pad + hidden, :]
    w3 = w_ref[sd_pad + hidden:sd_pad + 2 * hidden, :]
    b1 = b_ref[0:1, :]
    b2 = b_ref[1:2, :]
    b3 = b_ref[2:3, :]

    # fc1 + relu (MXU matmul, f32 accumulate; bias add / relu in f32)
    h1 = jnp.dot(x, w1, preferred_element_type=jnp.float32)
    h1 = jnp.maximum(h1 + b1, 0.0)
    # fc2 + relu
    h2 = jnp.dot(h1.astype(cd), w2, preferred_element_type=jnp.float32)
    h2 = jnp.maximum(h2 + b2, 0.0)
    # fc3 (logits, no activation) -- lane-dense 128-wide slab
    logits = jnp.dot(h2.astype(cd), w3, preferred_element_type=jnp.float32) + b3
    o_ref[...] = logits.astype(o_ref.dtype)


def pack_params(params, compute_dtype=jnp.bfloat16):
    """Pack parameters once (call when params are created/updated, NOT per forward).

    Weights (pre-transposed, (in, out)) are stacked row-wise into a single
    (sd_pad + 2*hidden, 128) buffer in `compute_dtype`; biases go into a tiny
    separate (8, 128) f32 buffer so bias-add/ReLU keep full precision.
    """
    w1, b1 = params["w1"], params["b1"]
    w2, b2 = params["w2"], params["b2"]
    w3, b3 = params["w3"], params["b3"]
    state_dim, hidden = w1.shape
    action_dim = w3.shape[1]
    assert hidden == HIDDEN, "packing scheme assumes hidden == 128"
    assert action_dim <= LANE, "packing scheme assumes action_dim <= 128"

    sd_pad = _round_up(state_dim, ALIGN)
    rows = sd_pad + 2 * hidden

    wbuf = jnp.zeros((rows, LANE), compute_dtype)
    wbuf = wbuf.at[:state_dim, :hidden].set(w1.astype(compute_dtype))
    wbuf = wbuf.at[sd_pad:sd_pad + hidden, :hidden].set(w2.astype(compute_dtype))
    wbuf = wbuf.at[sd_pad + hidden:sd_pad + 2 * hidden, :action_dim].set(
        w3.astype(compute_dtype))

    bbuf = jnp.zeros((SUB, LANE), jnp.float32)
    bbuf = bbuf.at[0, :hidden].set(b1.reshape(-1).astype(jnp.float32))
    bbuf = bbuf.at[1, :hidden].set(b2.reshape(-1).astype(jnp.float32))
    bbuf = bbuf.at[2, :action_dim].set(b3.reshape(-1).astype(jnp.float32))
    return wbuf, bbuf


def _default_block_b(batch):
    if batch <= 512:
        return _round_up(max(batch, SUB), SUB)          # single grid step
    # Even number of grid steps >= 2 (both v7x TensorCores get work), tile <= MAX_TILE.
    n_pairs = max(1, pl.cdiv(batch, 2 * MAX_TILE))
    return _round_up(pl.cdiv(batch, 2 * n_pairs), SUB)


def policy_network_forward(x, wbuf, bbuf, *, action_dim,
                           block_b=None, out_dtype=jnp.bfloat16):
    """x: (B, state_dim) or (state_dim,).  wbuf/bbuf from pack_params().

    out_dtype controls the kernel's HBM output store (bf16 halves write traffic);
    the returned logits are always float32 of shape (B, action_dim).
    """
    squeeze = (x.ndim == 1)
    if squeeze:
        x = x[None, :]
    B, state_dim = x.shape
    sd_pad = _round_up(state_dim, ALIGN)
    assert wbuf.shape == (sd_pad + 2 * HIDDEN, LANE), "wbuf does not match x's state_dim"
    assert bbuf.shape == (SUB, LANE) and bbuf.dtype == jnp.float32
    assert action_dim <= LANE

    if block_b is None:
        block_b = _default_block_b(B)
    block_b = _round_up(block_b, SUB)
    grid = (pl.cdiv(B, block_b),)

    kernel = functools.partial(
        _mlp_kernel, state_dim=state_dim, sd_pad=sd_pad, hidden=HIDDEN)

    out_itemsize = jnp.dtype(out_dtype).itemsize
    flops = 2 * B * (state_dim * HIDDEN + HIDDEN * HIDDEN + HIDDEN * LANE)
    bytes_accessed = (
        x.size * x.dtype.itemsize
        + wbuf.size * wbuf.dtype.itemsize
        + bbuf.size * bbuf.dtype.itemsize
        + B * LANE * out_itemsize
    )

    out = pl.pallas_call(
        kernel,
        out_shape=jax.ShapeDtypeStruct((B, LANE), out_dtype),
        grid=grid,
        in_specs=[
            pl.BlockSpec((block_b, state_dim), lambda i: (i, 0)),  # x tile (pipelined)
            pl.BlockSpec(wbuf.shape, lambda i: (0, 0)),            # weights: VMEM-resident
            pl.BlockSpec(bbuf.shape, lambda i: (0, 0)),            # biases:  VMEM-resident
        ],
        out_specs=pl.BlockSpec((block_b, LANE), lambda i: (i, 0)),
        compiler_params=pltpu.CompilerParams(dimension_semantics=("parallel",)),
        cost_estimate=pl.CostEstimate(
            flops=flops, transcendentals=0, bytes_accessed=bytes_accessed),
    )(x, wbuf, bbuf)

    logits = out[:, :action_dim].astype(jnp.float32)
    return logits[0] if squeeze else logits


def policy_network_apply(x, params, *, compute_dtype=jnp.bfloat16, **kw):
    """Convenience wrapper (packs per call — prefer pack_params + policy_network_forward)."""
    wbuf, bbuf = pack_params(params, compute_dtype=compute_dtype)
    return policy_network_forward(x, wbuf, bbuf,
                                  action_dim=params["w3"].shape[1], **kw)


def init_params(key, state_dim, action_dim, hidden=HIDDEN):
    """Matches PolicyNetwork's nn.Linear init; weights stored pre-transposed (in, out)."""
    k1, k2, k3, k4, k5, k6 = jax.random.split(key, 6)

    def lin(kw, kb, fan_in, fan_out):
        bound = 1.0 / jnp.sqrt(fan_in)
        w = jax.random.uniform(kw, (fan_in, fan_out), jnp.float32, -bound, bound)
        b = jax.random.uniform(kb, (fan_out,), jnp.float32, -bound, bound)
        return w, b

    w1, b1 = lin(k1, k2, state_dim, hidden)
    w2, b2 = lin(k3, k4, hidden, hidden)
    w3, b3 = lin(k5, k6, hidden, action_dim)
    return {"w1": w1, "b1": b1, "w2": w2, "b2": b2, "w3": w3, "b3": b3}


def _reference(x, p):
    h1 = jnp.maximum(x @ p["w1"] + p["b1"], 0.0)
    h2 = jnp.maximum(h1 @ p["w2"] + p["b2"], 0.0)
    return h2 @ p["w3"] + p["b3"]


if __name__ == "__main__":
    key = jax.random.PRNGKey(0)
    kx, kp = jax.random.split(key)

    state_dim, action_dim, batch = 32, 8, 8
    x = jax.random.normal(kx, (batch, state_dim), jnp.float32)
    params = init_params(kp, state_dim, action_dim)
    ref = _reference(x, params)

    # Default fast path: bf16 MXU operands + bf16 output store, f32 accumulation.
    wbuf, bbuf = pack_params(params)                       # packed ONCE, reused per call
    logits = policy_network_forward(x, wbuf, bbuf, action_dim=action_dim)
    jax.block_until_ready(logits)
    assert logits.shape == (batch, action_dim) and logits.dtype == jnp.float32
    assert jnp.allclose(logits, ref, atol=1e-1, rtol=1e-1)

    # Strict f32-operand / f32-store parity path.
    wbuf32, bbuf32 = pack_params(params, compute_dtype=jnp.float32)
    logits32 = policy_network_forward(x, wbuf32, bbuf32, action_dim=action_dim,
                                      out_dtype=jnp.float32)
    jax.block_until_ready(logits32)
    assert jnp.allclose(logits32, ref, atol=2e-4, rtol=2e-4)

    # Multi-step grid with a ragged last tile (no batch padding), resident weights.
    xb = jax.random.normal(kx, (300, state_dim), jnp.float32)
    logits_big = policy_network_forward(xb, wbuf32, bbuf32, action_dim=action_dim,
                                        out_dtype=jnp.float32, block_b=128)
    jax.block_until_ready(logits_big)
    assert logits_big.shape == (300, action_dim)
    assert jnp.allclose(logits_big, _reference(xb, params), atol=2e-4, rtol=2e-4)

    # Default tiling heuristic: even number of grid steps (>=2) on the bf16 path.
    xc = jax.random.normal(kx, (1200, state_dim), jnp.float32)
    logits_c = policy_network_forward(xc, wbuf, bbuf, action_dim=action_dim)
    jax.block_until_ready(logits_c)
    assert logits_c.shape == (1200, action_dim)
    assert jnp.allclose(logits_c, _reference(xc, params), atol=1e-1, rtol=1e-1)

    print("KERNEL_OK")
</pallas_src>

<mosaic_0001>
module attributes {stable_mosaic.version = 11 : i64} {
  func.func @_mlp_kernel(%arg0: i32, %arg1: memref<8x32xf32, #tpu.memory_space<vmem>>, %arg2: memref<288x128xbf16, #tpu.memory_space<vmem>>, %arg3: memref<8x128xf32, #tpu.memory_space<vmem>>, %arg4: memref<8x128xbf16, #tpu.memory_space<vmem>>) attributes {dimension_semantics = [#tpu.dimension_semantics<parallel>], iteration_bounds = array<i64: 1>, scalar_prefetch = 0 : i64, scratch_operands = 0 : i64, tpu.core_type = #tpu.core_type<tc>, window_params = [{transform_indices = @transform_0, window_bounds = array<i64: 8, 32>}, {pipeline_mode = #tpu.pipeline_mode<synchronous>, transform_indices = @transform_1, window_bounds = array<i64: 288, 128>}, {pipeline_mode = #tpu.pipeline_mode<synchronous>, transform_indices = @transform_2, window_bounds = array<i64: 8, 128>}, {transform_indices = @transform_3, window_bounds = array<i64: 8, 128>}]} {
    %c0 = arith.constant 0 : index
    %c0_0 = arith.constant 0 : index
    %0 = vector.load %arg1[%c0, %c0_0] : memref<8x32xf32, #tpu.memory_space<vmem>>, vector<8x32xf32>
    %1 = arith.truncf %0 : vector<8x32xf32> to vector<8x32xbf16>
    %c0_1 = arith.constant 0 : index
    %c0_2 = arith.constant 0 : index
    %2 = vector.load %arg2[%c0_1, %c0_2] : memref<288x128xbf16, #tpu.memory_space<vmem>>, vector<32x128xbf16>
    %c32 = arith.constant 32 : index
    %c0_3 = arith.constant 0 : index
    %3 = vector.load %arg2[%c32, %c0_3] : memref<288x128xbf16, #tpu.memory_space<vmem>>, vector<128x128xbf16>
    %c160 = arith.constant 160 : index
    %c0_4 = arith.constant 0 : index
    %4 = vector.load %arg2[%c160, %c0_4] : memref<288x128xbf16, #tpu.memory_space<vmem>>, vector<128x128xbf16>
    %c0_5 = arith.constant 0 : index
    %c0_6 = arith.constant 0 : index
    %5 = vector.load %arg3[%c0_5, %c0_6] : memref<8x128xf32, #tpu.memory_space<vmem>>, vector<1x128xf32>
    %c1 = arith.constant 1 : index
    %c0_7 = arith.constant 0 : index
    %6 = vector.load %arg3[%c1, %c0_7] : memref<8x128xf32, #tpu.memory_space<vmem>>, vector<1x128xf32>
    %c2 = arith.constant 2 : index
    %c0_8 = arith.constant 0 : index
    %7 = vector.load %arg3[%c2, %c0_8] : memref<8x128xf32, #tpu.memory_space<vmem>>, vector<1x128xf32>
    %cst = arith.constant dense<0.000000e+00> : vector<8x128xf32>
    %8 = tpu.matmul %1, %2, %cst {dimension_numbers = #tpu.dot_dimension_numbers<[1], [0], [0], [1], [0, 0, 1, 1], [], []>} : vector<8x32xbf16>, vector<32x128xbf16>, vector<8x128xf32> -> vector<8x128xf32>
    %9 = vector.broadcast %5 : vector<1x128xf32> to vector<8x128xf32>
    %10 = arith.addf %8, %9 : vector<8x128xf32>
    %cst_9 = arith.constant 0.000000e+00 : f32
    %11 = vector.broadcast %cst_9 : f32 to vector<8x128xf32>
    %12 = arith.maximumf %10, %11 : vector<8x128xf32>
    %13 = arith.truncf %12 : vector<8x128xf32> to vector<8x128xbf16>
    %cst_10 = arith.constant dense<0.000000e+00> : vector<8x128xf32>
    %14 = tpu.matmul %13, %3, %cst_10 {dimension_numbers = #tpu.dot_dimension_numbers<[1], [0], [0], [1], [0, 0, 1, 1], [], []>} : vector<8x128xbf16>, vector<128x128xbf16>, vector<8x128xf32> -> vector<8x128xf32>
    %15 = vector.broadcast %6 : vector<1x128xf32> to vector<8x128xf32>
    %16 = arith.addf %14, %15 : vector<8x128xf32>
    %cst_11 = arith.constant 0.000000e+00 : f32
    %17 = vector.broadcast %cst_11 : f32 to vector<8x128xf32>
    %18 = arith.maximumf %16, %17 : vector<8x128xf32>
    %19 = arith.truncf %18 : vector<8x128xf32> to vector<8x128xbf16>
    %cst_12 = arith.constant dense<0.000000e+00> : vector<8x128xf32>
    %20 = tpu.matmul %19, %4, %cst_12 {dimension_numbers = #tpu.dot_dimension_numbers<[1], [0], [0], [1], [0, 0, 1, 1], [], []>} : vector<8x128xbf16>, vector<128x128xbf16>, vector<8x128xf32> -> vector<8x128xf32>
    %21 = vector.broadcast %7 : vector<1x128xf32> to vector<8x128xf32>
    %22 = arith.addf %20, %21 : vector<8x128xf32>
    %23 = arith.truncf %22 : vector<8x128xf32> to vector<8x128xbf16>
    %c0_13 = arith.constant 0 : index
    %c0_14 = arith.constant 0 : index
    %24 = vector.load %arg4[%c0_13, %c0_14] : memref<8x128xbf16, #tpu.memory_space<vmem>>, vector<8x128xbf16>
    tpu.vector_store %arg4[%c0_13, %c0_14], %23 {strides = array<i32>} : memref<8x128xbf16, #tpu.memory_space<vmem>>, vector<8x128xbf16>,
    return
  }
  func.func @transform_0(%arg0: i32) -> (i32, i32) {
    %c0_i32 = arith.constant 0 : i32
    %c0_i32_0 = arith.constant 0 : i32
    return %arg0, %c0_i32 : i32, i32
  }
  func.func @transform_1(%arg0: i32) -> (i32, i32) {
    %c0_i32 = arith.constant 0 : i32
    %c0_i32_0 = arith.constant 0 : i32
    %c0_i32_1 = arith.constant 0 : i32
    return %c0_i32, %c0_i32_0 : i32, i32
  }
  func.func @transform_2(%arg0: i32) -> (i32, i32) {
    %c0_i32 = arith.constant 0 : i32
    %c0_i32_0 = arith.constant 0 : i32
    %c0_i32_1 = arith.constant 0 : i32
    return %c0_i32, %c0_i32_0 : i32, i32
  }
  func.func @transform_3(%arg0: i32) -> (i32, i32) {
    %c0_i32 = arith.constant 0 : i32
    %c0_i32_0 = arith.constant 0 : i32
    return %arg0, %c0_i32 : i32, i32
  }
}

</mosaic_0001>

<bundles_post_ra>
// kernel: tpu_custom_call.1
= control target key start
LH: loop header
LB: loop body
LE: loop exit
PB: predicated region body
PF: predicated region fallthrough
CT: control target
= control target key end

     0   :  { %8 = vsyncpa [#allocation3], 0  ;;  %s671_s0 = inlined_call_operand.hbm [shape: f32[8,32], index: 0, kind: input, shape index: {}]   ;;  %s672_s1 = inlined_call_operand.hbm [shape: bf16[288,128], index: 1, kind: input, shape index: {}]   ;;  %s673_s2 = inlined_call_operand.hbm [shape: f32[8,128], index: 2, kind: input, shape index: {}]   ;;  %s674_s3 = inlined_call_operand.hbm [shape: bf16[8,128], index: 3, kind: output, shape index: {}]  }
   0x1   :  { %9 = vsyncpa [#allocation6], 0 }
   0x2   :  { %10 = vsyncpa [#allocation4], 0  ;;  %s571_s12 = smov [#allocation5]   ;;  %s477_s16 = scalar_lea.hbm %s672_s1, 2304 }
   0x3   :  { %s26_s13 = sshll.u32 %s571_s12, 4  ;;  %p478_p0 = scmp.ne.s32.totalorder %s672_s1, %s477_s16  ;;  %s27_s13 = int_to_ptr.vmem [resolvable:$true] %s26_s13 }
   0x4   :  { %p481_p1 = scmp.lt.u32.totalorder %s477_s16, %s672_s1 }
   0x6   :  { %p483_p2 = pnand %p481_p1, %p478_p0 }
   0x8   :  { %486 = shalt.err (!%p483_p2)
}
   0x9   :  { %s487_s21 = scalar_lea.vmem %s27_s13, 2304  ;;  %p492_p4 = scmp.lt.s32.totalorder %s27_s13, %s27_s13 }
   0xa   :  { %p488_p3 = scmp.ne.s32.totalorder %s27_s13, %s487_s21  ;;  %p493_p5 = scmp.lt.s32.totalorder %s487_s21, %s487_s21 }
   0xc   :  { %p494_p6 = por %p493_p5, %p492_p4 }
   0xe   :  { %p495_p7 = pnand %p494_p6, %p488_p3 }
  0x10   :  { %498 = shalt.err (!%p495_p7)
}
  0x11   :  { %s572_s22 = smov 64   ;;  %s573_s23 = smov 4  }
  0x12   :  { %32 = dma.hbm_to_vmem [thread:$0]  %s672_s1, 2304, %s27_s13, [#allocation6], %s572_s22, %s572_s22, %s573_s23  }
  0x13   :  { %s574_s26 = smov [#allocation2]   ;;  %s575_s28 = smov [#allocation7]  }
  0x14   :  { %s17_s27 = sshll.u32 %s574_s26, 4  ;;  %s39_s29 = sshll.u32 %s575_s28, 4  ;;  %s18_s27 = int_to_ptr.vmem [resolvable:$true] %s17_s27  ;;  %s40_s29 = int_to_ptr.vmem [resolvable:$true] %s39_s29 }
  0x15   :  { %s499_s5 = scalar_lea.hbm %s671_s0, 128 }
  0x16   :  { %p500_p8 = scmp.ne.s32.totalorder %s671_s0, %s499_s5  ;;  %p503_p9 = scmp.lt.u32.totalorder %s499_s5, %s671_s0 }
  0x18   :  { %p505_p10 = pnand %p503_p9, %p500_p8 }
  0x1a   :  { %508 = shalt.err (!%p505_p10)
}
  0x1b   :  { %s509_s1 = scalar_lea.vmem %s18_s27, 128  ;;  %p514_p12 = scmp.lt.s32.totalorder %s18_s27, %s18_s27 }
  0x1c   :  { %p510_p11 = scmp.ne.s32.totalorder %s18_s27, %s509_s1  ;;  %p515_p13 = scmp.lt.s32.totalorder %s509_s1, %s509_s1 }
  0x1e   :  { %p516_p0 = por %p515_p13, %p514_p12 }
  0x20   :  { %p517_p1 = pnand %p516_p0, %p510_p11 }
  0x22   :  { %520 = shalt.err (!%p517_p1)
}
  0x23   :  { %20 = dma.hbm_to_vmem [thread:$0]  %s671_s0, 128, %s18_s27, [#allocation3]  }
  0x24   :  { %s521_s14 = scalar_lea.hbm %s673_s2, 128 }
  0x25   :  { %p522_p2 = scmp.ne.s32.totalorder %s673_s2, %s521_s14  ;;  %p525_p3 = scmp.lt.u32.totalorder %s521_s14, %s673_s2 }
  0x27   :  { %p527_p4 = pnand %p525_p3, %p522_p2 }
  0x29   :  { %530 = shalt.err (!%p527_p4)
}
  0x2a   :  { %s531_s19 = scalar_lea.vmem %s40_s29, 128  ;;  %p536_p6 = scmp.lt.s32.totalorder %s40_s29, %s40_s29 }
  0x2b   :  { %p532_p5 = scmp.ne.s32.totalorder %s40_s29, %s531_s19  ;;  %p537_p7 = scmp.lt.s32.totalorder %s531_s19, %s531_s19 }
  0x2d   :  { %p538_p8 = por %p537_p7, %p536_p6 }
  0x2f   :  { %p539_p9 = pnand %p538_p8, %p532_p5 }
  0x31   :  { %542 = shalt.err (!%p539_p9)
}
  0x32   :  { %42 = dma.hbm_to_vmem [thread:$0]  %s673_s2, 128, %s40_s29, [#allocation6]  }
  0x33   :  { %565 = dma.done.wait [#allocation3], 128  }
  0x34   :  { %566 = vsyncadd [#allocation3], 4294967168 }
  0x35   :  { %567 = dma.done.wait [#allocation6], 2432  }
  0x36   :  { %568 = vsyncadd [#allocation6], 4294964864  ;;  %v576_v0 = vmov 0.0   ;;  %vm577_vm0 = vmmov 0   ;;  %v459_v1 = vld [vmem:[#allocation5] sm:$0xff]   ;;  %v460_v2 = vld [vmem:[#allocation5 + $0x8] sm:$0xff]  }
  0x37   :  { %403 = vmatprep.subr.bf16.mxu0 %v576_v0  ;;  %407 = vmatprep.mubr.msk.bf16.mxu0 %vm577_vm0, %v576_v0  ;;  %v53_v3 = vld [vmem:[#allocation2] sm:$0xff]  ;;  %v461_v4 = vld [vmem:[#allocation5 + $0x10] sm:$0xff]   ;;  %vm110_vm1 = vcmask 261120   ;;  %v463_v7 = vld [vmem:[#allocation5 + $0x20] sm:$0xff]   ;;  %s578_s2 = smov [#allocation8]  }
  0x38   :  { %411 = vmatprep.subr.bf16.mxu1 %v576_v0  ;;  %427 = vmatprep.mubr.msk.bf16.mxu1 %vm577_vm0, %v576_v0  ;;  %v54_v5 = vpack.c.bf16 %v53_v3, %v53_v3  ;;  %v462_v6 = vld [vmem:[#allocation5 + $0x18] sm:$0xff]   ;;  %v464_v8 = vld [vmem:[#allocation5 + $0x28] sm:$0xff]   ;;  %v465_v9 = vld [vmem:[#allocation5 + $0x30] sm:$0xff]   ;;  %s350_s21 = sshll.u32 %s578_s2, 4  ;;  %s351_s21 = int_to_ptr.vmem [resolvable:$true] %s350_s21 }
  0x39   :  { %404 = vmatpush3.bf16.msra.mxu0 %v459_v1  ;;  %412 = vmatpush3.bf16.msra.mxu1 %v461_v4  ;;  %v466_v10 = vld [vmem:[#allocation5 + $0x38] sm:$0xff]   ;;  %v467_v11 = vld [vmem:[#allocation5 + $0x40] sm:$0xff]   ;;  %v468_v12 = vld [vmem:[#allocation5 + $0x48] sm:$0xff]   ;;  %s543_s22 = scalar_lea.vmem %s351_s21, 64  ;;  %p548_p11 = scmp.lt.s32.totalorder %s351_s21, %s351_s21 }
  0x3a   :  { %405 = vmatprep.subr.bf16.mxu0 %v576_v0  ;;  %413 = vmatprep.subr.bf16.mxu1 %v576_v0  ;;  %v469_v13 = vld [vmem:[#allocation5 + $0x50] sm:$0xff]   ;;  %v470_v14 = vld [vmem:[#allocation5 + $0x58] sm:$0xff]   ;;  %v471_v15 = vld [vmem:[#allocation5 + $0x60] sm:$0xff]   ;;  %p544_p10 = scmp.ne.s32.totalorder %s351_s21, %s543_s22  ;;  %p549_p12 = scmp.lt.s32.totalorder %s543_s22, %s543_s22 }
  0x3b   :  { %v472_v16 = vld [vmem:[#allocation5 + $0x68] sm:$0xff]   ;;  %v473_v17 = vld [vmem:[#allocation5 + $0x70] sm:$0xff]   ;;  %v474_v18 = vld [vmem:[#allocation5 + $0x78] sm:$0xff]  }
  0x3c   :  { %v360_v19 = vld [vmem:[#allocation7] ss:$0 sm:$0xff]  ;;  %v475_v27 = vld [vmem:[#allocation5 + $0x80] sm:$0xff]   ;;  %v476_v28 = vld [vmem:[#allocation5 + $0x88] sm:$0xff]   ;;  %p550_p13 = por %p549_p12, %p548_p11 }
  0x3d   :  { %406 = vmatpush3.bf16.msra.mxu0 %v460_v2  ;;  %414 = vmatpush3.bf16.msra.mxu1 %v462_v6  ;;  %v364_v29 = vld [vmem:[#allocation7 + $0x1] ss:$0 sm:$0xff]  ;;  %v373_v37 = vld [vmem:[#allocation7 + $0x2] ss:$0 sm:$0xff] }
  0x3e   :  { %431 = vmatprep.subr.bf16.mxu0 %v576_v0  ;;  %415 = vmatprep.subr.bf16.mxu1 %v576_v0  ;;  %p551_p0 = pnand %p550_p13, %p544_p10 }
  0x40   :  { %408 = vmatmul.mubr.msk.bf16.vlgmr.msra.gmra.mrb[0].mxu0 %vm110_vm1, %v54_v5 }
  0x41   :  { %447 = vmatprep.mubr.msk.bf16.mxu0 %vm577_vm0, %v576_v0  ;;  %416 = vmatpush3.bf16.msra.mxu1 %v463_v7 }
  0x42   :  { %417 = vmatprep.subr.bf16.mxu1 %v576_v0  ;;  %432 = vmatpush3.bf16.msra.mxu0 %v469_v13 }
  0x43   :  { %433 = vmatprep.subr.bf16.mxu0 %v576_v0 }
  0x45   :  { %418 = vmatpush3.bf16.msra.mxu1 %v464_v8 }
  0x46   :  { %419 = vmatprep.subr.bf16.mxu1 %v576_v0  ;;  %434 = vmatpush3.bf16.msra.mxu0 %v470_v14 }
  0x47   :  { %435 = vmatprep.subr.bf16.mxu0 %v576_v0 }
  0x49   :  { %420 = vmatpush3.bf16.msra.mxu1 %v465_v9 }
  0x4a   :  { %421 = vmatprep.subr.bf16.mxu1 %v576_v0  ;;  %436 = vmatpush3.bf16.msra.mxu0 %v471_v15 }
  0x4b   :  { %437 = vmatprep.subr.bf16.mxu0 %v576_v0 }
  0x4d   :  { %422 = vmatpush3.bf16.msra.mxu1 %v466_v10 }
  0x4e   :  { %423 = vmatprep.subr.bf16.mxu1 %v576_v0  ;;  %438 = vmatpush3.bf16.msra.mxu0 %v472_v16 }
  0x4f   :  { %439 = vmatprep.subr.bf16.mxu0 %v576_v0 }
  0x51   :  { %424 = vmatpush3.bf16.msra.mxu1 %v467_v11 }
  0x52   :  { %425 = vmatprep.subr.bf16.mxu1 %v576_v0  ;;  %440 = vmatpush3.bf16.msra.mxu0 %v473_v17 }
  0x53   :  { %441 = vmatprep.subr.bf16.mxu0 %v576_v0 }
  0x55   :  { %426 = vmatpush3.bf16.msra.mxu1 %v468_v12 }
  0x56   :  { %442 = vmatpush3.bf16.msra.mxu0 %v474_v18 }
  0x57   :  { %443 = vmatprep.subr.bf16.mxu0 %v576_v0 }
  0x5a   :  { %444 = vmatpush3.bf16.msra.mxu0 %v475_v27 }
  0x5b   :  { %445 = vmatprep.subr.bf16.mxu0 %v576_v0 }
  0x5e   :  { %446 = vmatpush3.bf16.msra.mxu0 %v476_v28 }
 0x113   :  { %v148_v20 = vpop.f32.mrb[0].mxu0 }
 0x114   :  { %v149_v21 = vadd.f32 %v360_v19, %v148_v20  ;;  %v409_v22 = vpop.f32.mrb[1].mxu0 }
 0x115   :  { %v151_v23 = vpop.f32.mrb[2].mxu0 }
 0x116   :  { %v154_v24 = vmax.f32 %v149_v21, 0.0  ;;  %v410_v25 = vpop.f32.mrb[3].mxu0 }
 0x118   :  { %v155_v26 = vpack.c.bf16 %v154_v24, %v154_v24 }
 0x11a   :  { %428 = vmatmul.mubr.bf16.vlgmr.msra.gmra.mrb[0].mxu1 %v155_v26 }
 0x1ed   :  { %v242_v30 = vpop.f32.mrb[0].mxu1 }
 0x1ee   :  { %v243_v31 = vadd.f32 %v364_v29, %v242_v30  ;;  %v429_v32 = vpop.f32.mrb[1].mxu1 }
 0x1ef   :  { %v245_v33 = vpop.f32.mrb[2].mxu1 }
 0x1f0   :  { %v248_v34 = vmax.f32 %v243_v31, 0.0  ;;  %v430_v35 = vpop.f32.mrb[3].mxu1 }
 0x1f2   :  { %v249_v36 = vpack.c.bf16 %v248_v34, %v248_v34 }
 0x1f4   :  { %448 = vmatmul.mubr.bf16.vlgmr.msra.gmra.mrb[4].mxu0 %v249_v36 }
 0x2c7   :  { %v336_v38 = vpop.f32.mrb[4].mxu0 }
 0x2c8   :  { %v337_v39 = vadd.f32 %v373_v37, %v336_v38  ;;  %v449_v40 = vpop.f32.mrb[5].mxu0 }
 0x2c9   :  { %v339_v41 = vpop.f32.mrb[6].mxu0 }
 0x2ca   :  { %v342_v42 = vpack.c.bf16 %v337_v39, %v337_v39  ;;  %v450_v43 = vpop.f32.mrb[7].mxu0 }
 0x2cc   :  { %343 = vst [vmem:[#allocation8] sm:$0xf] %v342_v42 }
 0x2cd   :  { %554 = shalt.err (!%p551_p0)
}
 0x2ce   :  { %s555_s25 = scalar_lea.hbm %s674_s3, 64 }
 0x2cf   :  { %p556_p1 = scmp.ne.s32.totalorder %s674_s3, %s555_s25  ;;  %p559_p2 = scmp.lt.u32.totalorder %s555_s25, %s674_s3 }
 0x2d1   :  { %p561_p3 = pnand %p559_p2, %p556_p1 }
 0x2d3   :  { %564 = shalt.err (!%p561_p3)
}
 0x2d4   :  { %353 = dma.vmem_to_hbm [thread:$0]  %s351_s21, 64, %s674_s3, [#allocation4]  }
 0x2d5   :  { %569 = dma.done.wait [#allocation4], 64  }
 0x2d6   :  { %570 = vsyncadd [#allocation4], 4294967232 }
 0x2d7   :  { %357 = vsyncpa [#allocation3], 1 }
 0x2d8   :  { %358 = vsyncpa [#allocation6], 1 }
 0x2d9   :  { %359 = vsyncpa [#allocation4], 1 }

</bundles_post_ra>
